<compile_context>
chip_gen: v7x
topology: tpu7x:2x2x1
jax: 0.10.0
libtpu: 0.0.40
codegen_flags: <defaults>
</compile_context>

<pallas_src>
import jax
import jax.numpy as jnp
import numpy as np
from jax import lax
from jax.experimental import pallas as pl
from jax.experimental.pallas import tpu as pltpu

# ---- static configuration (constructor-level hyperparameters) ----
N_SIM = 8              # number of simulated samples
A_IN = 32              # audio_model input features
I_IN = 32              # imu_model input features
H = 16                 # per-modality projection dim
D = 2 * H              # concatenated embedding dim (r1 ++ r2) = 32
TEMPERATURE = 0.5      # self.T
INV_T = 1.0 / TEMPERATURE
EPS = 1e-8             # torch F.cosine_similarity eps
LANE = 128             # lane width -> query-tile alignment


def contrastive_loss_kernel(zs_ref, ztT_ref, simlab_ref, qlab_ref, out_ref):
    # zs_ref:     (N_SIM, D)   pre-normalized simulated embeddings, pre-scaled by 1/T
    # ztT_ref:    (D, TQ)      query embeddings, queries along the lane axis
    # simlab_ref: (N_SIM, 1)   simulated labels
    # qlab_ref:   (1, TQ)      query labels
    # out_ref:    (1, 1, TQ)   per-query losses (lane-dense row)
    ztT = ztT_ref[...]                                               # (D, TQ)

    # cos/T matrix from one MXU matmul: dots[j,q] = (zs_hat[j]/T) . zt[q]
    dots = jnp.dot(zs_ref[...], ztT,
                   preferred_element_type=jnp.float32)               # (N_SIM, TQ)

    # 1 / max(||zt_q||, eps)  == rsqrt(max(sum_sq, eps^2)); lane-dense (1, TQ) row
    sumsq = jnp.sum(ztT * ztT, axis=0, keepdims=True)                # (1, TQ)
    inv_norm_t = lax.rsqrt(jnp.maximum(sumsq, EPS * EPS))            # (1, TQ)
    scaled = dots * inv_norm_t                                       # (N_SIM, TQ)

    # stable log of den = sum_j exp(cos_j / T)
    m = jnp.max(scaled, axis=0, keepdims=True)                       # (1, TQ)
    log_den = m + jnp.log(jnp.sum(jnp.exp(scaled - m),
                                  axis=0, keepdims=True))            # (1, TQ)

    # positive-pair (label-matched) reduction
    mask = (simlab_ref[...] == qlab_ref[...]).astype(jnp.float32)    # (N_SIM, TQ)
    ps = jnp.sum(mask, axis=0, keepdims=True)                        # (1, TQ)
    log_sum = jnp.sum(mask * (scaled - log_den), axis=0, keepdims=True)

    # ps == 0 -> inf/nan, intentionally matching the PyTorch module's behavior.
    loss = -log_sum * pl.reciprocal(ps * float(N_SIM), approx=True)  # (1, TQ)
    out_ref[...] = loss[None, :, :]                                  # (1, 1, TQ)


def _simulated_embeddings(sim_audio, sim_imu, params):
    """Hoisted, loop-invariant part: exact two-step matmuls of the PyTorch module,
    normalized (torch cosine_similarity eps clamp) and pre-scaled by 1/T."""
    wa, ba, wi, bi, wp1, wp2 = params
    z1 = sim_audio.astype(jnp.float32) @ wa + ba
    z2 = sim_imu.astype(jnp.float32) @ wi + bi
    r1 = z1 @ wp1
    r2 = z2 @ wp2
    zs = jnp.concatenate([r1, r2], axis=1)                           # (N_SIM, D)
    norm_s = jnp.sqrt(jnp.sum(zs * zs, axis=1, keepdims=True))       # (N_SIM, 1)
    return (zs / jnp.maximum(norm_s, EPS)) * INV_T                   # (N_SIM, D)


def _pick_tile(q):
    """Lane-aligned query tile: whole (padded) batch when small; 512-1024 with
    >= 2 grid steps when large so v7x's second TensorCore gets work."""
    qpad_min = ((q + LANE - 1) // LANE) * LANE
    if qpad_min <= 256:
        return qpad_min
    half = (qpad_min // 2 + LANE - 1) // LANE * LANE
    return min(1024, max(LANE, half))


def contrastive_loss_batched(zt, qlabs, sim_labels, sim_audio, sim_imu, params):
    """zt: (Q, D) query embeddings (torch r1_r2_ flattened); qlabs: (Q,) int labels.
    Returns (Q,) losses; loss[q] == module.forward(zt[q], qlabs[q])."""
    q = zt.shape[0]
    zt = zt.astype(jnp.float32)
    qlabs = qlabs.astype(jnp.int32)

    tq = _pick_tile(q)
    qpad = ((q + tq - 1) // tq) * tq
    pad = qpad - q
    if pad:
        zt = jnp.concatenate([zt, jnp.broadcast_to(zt[-1:], (pad, D))], axis=0)
        qlabs = jnp.concatenate(
            [qlabs, jnp.broadcast_to(qlabs[-1:], (pad,))], axis=0)
    grid = qpad // tq

    zs_hat = _simulated_embeddings(sim_audio, sim_imu, params)        # (N_SIM, D)
    ztT = zt.T                                                        # (D, qpad) lane-major
    simlab = sim_labels.reshape(N_SIM, 1).astype(jnp.int32)           # (N_SIM, 1)
    qlab_row = qlabs.reshape(1, qpad)                                 # (1, qpad)

    out = pl.pallas_call(
        contrastive_loss_kernel,
        out_shape=jax.ShapeDtypeStruct((grid, 1, qpad // grid), jnp.float32),
        grid_spec=pltpu.PrefetchScalarGridSpec(
            num_scalar_prefetch=0,
            grid=(grid,),
            in_specs=[
                pl.BlockSpec((N_SIM, D), lambda i: (0, 0)),    # zs_hat (loop-invariant)
                pl.BlockSpec((D, tq), lambda i: (0, i)),       # query tile, lane-major
                pl.BlockSpec((N_SIM, 1), lambda i: (0, 0)),    # sim labels
                pl.BlockSpec((1, tq), lambda i: (0, i)),       # query labels
            ],
            out_specs=pl.BlockSpec((1, 1, tq), lambda i: (i, 0, 0)),  # lane-dense losses
        ),
        compiler_params=pltpu.CompilerParams(
            dimension_semantics=("parallel",)),
    )(zs_hat, ztT, simlab, qlab_row)
    return out.reshape(qpad)[:q]


def contrastive_loss(r1_r2_, lab, sim_labels, sim_audio, sim_imu, params):
    """Single-query forward matching the PyTorch module: r1_r2_ (D,1), lab -> (1,)."""
    zt = r1_r2_.reshape(1, D)
    qlabs = lab.reshape(1)
    return contrastive_loss_batched(zt, qlabs, sim_labels, sim_audio, sim_imu,
                                    params)


def reference(r1_r2_, lab, sim_labels, sim_audio, sim_imu, params):
    """Pure-JAX reference mirroring the PyTorch forward (per query)."""
    wa, ba, wi, bi, wp1, wp2 = params
    z1 = sim_audio @ wa + ba
    z2 = sim_imu @ wi + bi
    r1 = z1 @ wp1
    r2 = z2 @ wp2
    zs = jnp.concatenate([r1, r2], axis=1)                  # (N, D)
    zti = r1_r2_.reshape(D)
    dots = zs @ zti
    norm_s = jnp.linalg.norm(zs, axis=1)
    norm_t = jnp.linalg.norm(zti)
    cos = dots / (jnp.maximum(norm_s, EPS) * jnp.maximum(norm_t, EPS))
    scaled = cos / TEMPERATURE
    den = jnp.sum(jnp.exp(scaled))
    mask = (sim_labels == lab).astype(jnp.float32)
    ps = jnp.sum(mask)
    log_sum = jnp.sum(mask * (scaled - jnp.log(den)))
    return jnp.reshape(-1.0 / (ps * N_SIM) * log_sum, (1,))


if __name__ == "__main__":
    key = jax.random.PRNGKey(0)
    keys = jax.random.split(key, 10)

    # deterministic synthetic parameters (audio_model, imu_model, prj_net)
    wa = jax.random.normal(keys[0], (A_IN, H), jnp.float32) * 0.1
    ba = jax.random.normal(keys[1], (1, H), jnp.float32) * 0.1
    wi = jax.random.normal(keys[2], (I_IN, H), jnp.float32) * 0.1
    bi = jax.random.normal(keys[3], (1, H), jnp.float32) * 0.1
    wp1 = jax.random.normal(keys[4], (H, H), jnp.float32) * 0.1
    wp2 = jax.random.normal(keys[5], (H, H), jnp.float32) * 0.1
    params = (wa, ba, wi, bi, wp1, wp2)

    # simulated dataset (get_simulated_data)
    sim_audio = jax.random.normal(keys[6], (N_SIM, A_IN), jnp.float32)
    sim_imu = jax.random.normal(keys[7], (N_SIM, I_IN), jnp.float32)
    sim_labels = jnp.array([0, 1, 2, 0, 1, 2, 0, 1], dtype=jnp.int32)

    # batched queries: Q per-query forward passes fused into one gridded call
    Q = 16
    zt = jax.random.normal(keys[8], (Q, D), jnp.float32)
    qlabs = jax.random.randint(keys[9], (Q,), 0, 3, dtype=jnp.int32)

    losses = jax.block_until_ready(
        contrastive_loss_batched(zt, qlabs, sim_labels, sim_audio, sim_imu,
                                 params))
    ref = jnp.stack([
        reference(zt[i].reshape(D, 1), qlabs[i], sim_labels, sim_audio,
                  sim_imu, params)[0] for i in range(Q)
    ])
    np.testing.assert_allclose(np.asarray(losses), np.asarray(ref),
                               rtol=2e-3, atol=2e-4)

    # single-query call matching the torch module's forward signature
    r1_r2_ = zt[0].reshape(D, 1)
    lab = qlabs[0]
    loss1 = jax.block_until_ready(
        contrastive_loss(r1_r2_, lab, sim_labels, sim_audio, sim_imu, params))
    ref1 = reference(r1_r2_, lab, sim_labels, sim_audio, sim_imu, params)
    np.testing.assert_allclose(np.asarray(loss1), np.asarray(ref1),
                               rtol=2e-3, atol=2e-4)

    print("KERNEL_OK")
</pallas_src>

<mosaic_0001>
module attributes {stable_mosaic.version = 11 : i64} {
  func.func @contrastive_loss_kernel(%arg0: i32, %arg1: memref<8x32xf32, #tpu.memory_space<vmem>>, %arg2: memref<32x128xf32, #tpu.memory_space<vmem>>, %arg3: memref<8x1xi32, #tpu.memory_space<vmem>>, %arg4: memref<1x128xi32, #tpu.memory_space<vmem>>, %arg5: memref<1x1x128xf32, #tpu.memory_space<vmem>>) attributes {dimension_semantics = [#tpu.dimension_semantics<parallel>], iteration_bounds = array<i64: 1>, scalar_prefetch = 0 : i64, scratch_operands = 0 : i64, tpu.core_type = #tpu.core_type<tc>, window_params = [{pipeline_mode = #tpu.pipeline_mode<synchronous>, transform_indices = @transform_0, window_bounds = array<i64: 8, 32>}, {transform_indices = @transform_1, window_bounds = array<i64: 32, 128>}, {pipeline_mode = #tpu.pipeline_mode<synchronous>, transform_indices = @transform_2, window_bounds = array<i64: 8, 1>}, {transform_indices = @transform_3, window_bounds = array<i64: 1, 128>}, {transform_indices = @transform_4, window_bounds = array<i64: 1, 1, 128>}]} {
    %c0 = arith.constant 0 : index
    %c0_0 = arith.constant 0 : index
    %0 = vector.load %arg2[%c0, %c0_0] : memref<32x128xf32, #tpu.memory_space<vmem>>, vector<32x128xf32>
    %c0_1 = arith.constant 0 : index
    %c0_2 = arith.constant 0 : index
    %1 = vector.load %arg1[%c0_1, %c0_2] : memref<8x32xf32, #tpu.memory_space<vmem>>, vector<8x32xf32>
    %cst = arith.constant dense<0.000000e+00> : vector<8x128xf32>
    %2 = tpu.matmul %1, %0, %cst {dimension_numbers = #tpu.dot_dimension_numbers<[1], [0], [0], [1], [0, 0, 1, 1], [], []>} : vector<8x32xf32>, vector<32x128xf32>, vector<8x128xf32> -> vector<8x128xf32>
    %3 = arith.mulf %0, %0 : vector<32x128xf32>
    %cst_3 = arith.constant dense<0.000000e+00> : vector<128xf32>
    %4 = vector.multi_reduction <add>, %3, %cst_3 [0] : vector<32x128xf32> to vector<128xf32>
    %5 = vector.shape_cast %4 : vector<128xf32> to vector<1x128xf32>
    %cst_4 = arith.constant 1.000000e-16 : f32
    %6 = vector.broadcast %cst_4 : f32 to vector<1x128xf32>
    %7 = arith.maximumf %5, %6 : vector<1x128xf32>
    %8 = math.rsqrt %7 : vector<1x128xf32>
    %9 = vector.broadcast %8 : vector<1x128xf32> to vector<8x128xf32>
    %10 = arith.mulf %2, %9 : vector<8x128xf32>
    %cst_5 = arith.constant dense<0xFF800000> : vector<128xf32>
    %11 = vector.multi_reduction <maximumf>, %10, %cst_5 [0] : vector<8x128xf32> to vector<128xf32>
    %12 = vector.shape_cast %11 : vector<128xf32> to vector<1x128xf32>
    %13 = vector.broadcast %12 : vector<1x128xf32> to vector<8x128xf32>
    %14 = arith.subf %10, %13 : vector<8x128xf32>
    %15 = math.exp %14 : vector<8x128xf32>
    %cst_6 = arith.constant dense<0.000000e+00> : vector<128xf32>
    %16 = vector.multi_reduction <add>, %15, %cst_6 [0] : vector<8x128xf32> to vector<128xf32>
    %17 = vector.shape_cast %16 : vector<128xf32> to vector<1x128xf32>
    %18 = math.log %17 : vector<1x128xf32>
    %19 = arith.addf %12, %18 : vector<1x128xf32>
    %c0_7 = arith.constant 0 : index
    %c0_8 = arith.constant 0 : index
    %20 = vector.load %arg3[%c0_7, %c0_8] : memref<8x1xi32, #tpu.memory_space<vmem>>, vector<8x1xi32>
    %c0_9 = arith.constant 0 : index
    %c0_10 = arith.constant 0 : index
    %21 = vector.load %arg4[%c0_9, %c0_10] : memref<1x128xi32, #tpu.memory_space<vmem>>, vector<1x128xi32>
    %22 = vector.broadcast %20 : vector<8x1xi32> to vector<8x128xi32>
    %23 = vector.broadcast %21 : vector<1x128xi32> to vector<8x128xi32>
    %24 = arith.cmpi eq, %22, %23 : vector<8x128xi32>
    %25 = arith.extui %24 : vector<8x128xi1> to vector<8x128xi32>
    %26 = arith.sitofp %25 : vector<8x128xi32> to vector<8x128xf32>
    %cst_11 = arith.constant dense<0.000000e+00> : vector<128xf32>
    %27 = vector.multi_reduction <add>, %26, %cst_11 [0] : vector<8x128xf32> to vector<128xf32>
    %28 = vector.shape_cast %27 : vector<128xf32> to vector<1x128xf32>
    %29 = vector.broadcast %19 : vector<1x128xf32> to vector<8x128xf32>
    %30 = arith.subf %10, %29 : vector<8x128xf32>
    %31 = arith.mulf %26, %30 : vector<8x128xf32>
    %cst_12 = arith.constant dense<0.000000e+00> : vector<128xf32>
    %32 = vector.multi_reduction <add>, %31, %cst_12 [0] : vector<8x128xf32> to vector<128xf32>
    %33 = vector.shape_cast %32 : vector<128xf32> to vector<1x128xf32>
    %cst_13 = arith.constant 0.000000e+00 : f32
    %34 = vector.broadcast %cst_13 : f32 to vector<1x128xf32>
    %35 = arith.subf %34, %33 : vector<1x128xf32>
    %cst_14 = arith.constant 8.000000e+00 : f32
    %36 = vector.broadcast %cst_14 : f32 to vector<1x128xf32>
    %37 = arith.mulf %28, %36 : vector<1x128xf32>
    %38 = tpu.reciprocal %37 {approx = true} : vector<1x128xf32> -> vector<1x128xf32>
    %39 = arith.mulf %35, %38 : vector<1x128xf32>
    %40 = vector.shape_cast %39 : vector<1x128xf32> to vector<1x1x128xf32>
    %c0_15 = arith.constant 0 : index
    %c0_16 = arith.constant 0 : index
    %c0_17 = arith.constant 0 : index
    %41 = vector.load %arg5[%c0_15, %c0_16, %c0_17] : memref<1x1x128xf32, #tpu.memory_space<vmem>>, vector<1x1x128xf32>
    tpu.vector_store %arg5[%c0_15, %c0_16, %c0_17], %40 {strides = array<i32>} : memref<1x1x128xf32, #tpu.memory_space<vmem>>, vector<1x1x128xf32>,
    return
  }
  func.func @transform_0(%arg0: i32) -> (i32, i32) {
    %c0_i32 = arith.constant 0 : i32
    %c0_i32_0 = arith.constant 0 : i32
    %c0_i32_1 = arith.constant 0 : i32
    return %c0_i32, %c0_i32_0 : i32, i32
  }
  func.func @transform_1(%arg0: i32) -> (i32, i32) {
    %c0_i32 = arith.constant 0 : i32
    %c0_i32_0 = arith.constant 0 : i32
    return %c0_i32, %arg0 : i32, i32
  }
  func.func @transform_2(%arg0: i32) -> (i32, i32) {
    %c0_i32 = arith.constant 0 : i32
    %c0_i32_0 = arith.constant 0 : i32
    %c0_i32_1 = arith.constant 0 : i32
    return %c0_i32, %c0_i32_0 : i32, i32
  }
  func.func @transform_3(%arg0: i32) -> (i32, i32) {
    %c0_i32 = arith.constant 0 : i32
    %c0_i32_0 = arith.constant 0 : i32
    return %c0_i32, %arg0 : i32, i32
  }
  func.func @transform_4(%arg0: i32) -> (i32, i32, i32) {
    %c0_i32 = arith.constant 0 : i32
    %c0_i32_0 = arith.constant 0 : i32
    %c0_i32_1 = arith.constant 0 : i32
    return %arg0, %c0_i32, %c0_i32_0 : i32, i32, i32
  }
}

</mosaic_0001>

<bundles_post_ra>
// kernel: tpu_custom_call.1
= control target key start
LH: loop header
LB: loop body
LE: loop exit
PB: predicated region body
PF: predicated region fallthrough
CT: control target
= control target key end

     0   :  { %9 = vsyncpa [#allocation3], 0  ;;  %s347_s0 = inlined_call_operand.vmem [shape: f32[8,32], index: 0, kind: input, shape index: {}]   ;;  %s348_s1 = inlined_call_operand.hbm [shape: f32[32,128], index: 1, kind: input, shape index: {}]   ;;  %s349_s2 = inlined_call_operand.vmem [shape: s32[8,1], index: 2, kind: input, shape index: {}]   ;;  %s350_s3 = inlined_call_operand.vmem [shape: s32[1,128], index: 3, kind: input, shape index: {}]   ;;  %s351_s4 = inlined_call_operand.hbm [shape: f32[1,1,128], index: 4, kind: output, shape index: {}]  }
   0x1   :  { %10 = vsyncpa [#allocation4], 0  ;;  %s281_s15 = smov [#allocation2]   ;;  %s233_s19 = scalar_lea.hbm %s348_s1, 512 }
   0x2   :  { %s18_s16 = sshll.u32 %s281_s15, 4  ;;  %p234_p0 = scmp.ne.s32.totalorder %s348_s1, %s233_s19  ;;  %s19_s16 = int_to_ptr.vmem [resolvable:$true] %s18_s16 }
   0x3   :  { %p237_p1 = scmp.lt.u32.totalorder %s233_s19, %s348_s1 }
   0x5   :  { %p239_p2 = pnand %p237_p1, %p234_p0 }
   0x7   :  { %242 = shalt.err (!%p239_p2)
}
   0x8   :  { %s243_s24 = scalar_lea.vmem %s19_s16, 512  ;;  %p248_p4 = scmp.lt.s32.totalorder %s19_s16, %s19_s16 }
   0x9   :  { %p244_p3 = scmp.ne.s32.totalorder %s19_s16, %s243_s24  ;;  %p249_p5 = scmp.lt.s32.totalorder %s243_s24, %s243_s24 }
   0xb   :  { %p250_p6 = por %p249_p5, %p248_p4 }
   0xd   :  { %p251_p7 = pnand %p250_p6, %p244_p3 }
   0xf   :  { %254 = shalt.err (!%p251_p7)
}
  0x10   :  { %s282_s25 = smov 128   ;;  %s283_s26 = smov 8  }
  0x11   :  { %24 = dma.hbm_to_vmem [thread:$0]  %s348_s1, 512, %s19_s16, [#allocation3], %s282_s25, %s282_s25, %s283_s26  }
  0x12   :  { %277 = dma.done.wait [#allocation3], 512  }
  0x13   :  { %278 = vsyncadd [#allocation3], 4294966784  ;;  %v284_v0 = vmov 0.0|0.0   ;;  %vm285_vm0 = vmmov 0   ;;  %v286_v1 = vmov 0.0   ;;  %v287_v2 = vmov 0  }
  0x14   :  { %210 = vmatprep.subr.bf16.mxu0 %v284_v0  ;;  %207 = vmatprep.mubr.msk.f32.mxu0 %vm285_vm0, %v286_v1  ;;  %v32_v3 = vld [vmem:[#allocation2] sm:$0xff]  ;;  %v33_v4 = vld [vmem:[#allocation2 + $0x8] sm:$0xff]  ;;  %v34_v5 = vld [vmem:[#allocation2 + $0x10] sm:$0xff]  ;;  %vm37_vm1 = vcmask 261120  }
  0x15   :  { %224 = vset.pattern.permute.xlu0 %v287_v2  ;;  %v211_v6 = vpack.c.bf16 %v33_v4, %v32_v3  ;;  %v111_v7 = vmul.f32 %v32_v3, %v32_v3  ;;  %v112_v8 = vmul.f32 %v33_v4, %v33_v4  ;;  %v35_v9 = vld [vmem:[#allocation2 + $0x18] sm:$0xff]  ;;  %v113_v10 = vmul.f32 %v34_v5, %v34_v5  ;;  %v145_v11 = vld [vmem:[%s349_s2] sm:$0xff] }
  0x16   :  { %148 = vperm.xlu0 %224, %v145_v11   ;;  %v214_v13 = vpack.c.bf16 %v35_v9, %v34_v5  ;;  %v114_v14 = vmul.f32 %v35_v9, %v35_v9  ;;  %v36_v17 = vld [vmem:[%s347_s0] sm:$0xff] }
  0x17   :  { %212 = vmatpush3.bf16.msra.mxu0 %v211_v6  ;;  %v115_v12 = vadd.f32 %v112_v8, %v111_v7  ;;  %v192_v37 = vld [vmem:[%s350_s3] ss:$0 sm:$0xff]  ;;  %s288_s3 = smov [#allocation5]  }
  0x18   :  { %213 = vmatprep.subr.bf16.mxu0 %v284_v0  ;;  %s182_s6 = sshll.u32 %s288_s3, 4  ;;  %s183_s6 = int_to_ptr.vmem [resolvable:$true] %s182_s6 }
  0x19   :  { %v116_v15 = vadd.f32 %v115_v12, %v113_v10  ;;  %s255_s7 = scalar_lea.vmem %s183_s6, 16  ;;  %s259_s8 = scalar_lea.vmem %s183_s6, 32 }
  0x1a   :  { %p256_p8 = scmp.ne.s32.totalorder %s183_s6, %s255_s7  ;;  %p260_p9 = scmp.lt.s32.totalorder %s183_s6, %s183_s6 }
  0x1b   :  { %215 = vmatpush3.bf16.msra.mxu0 %v214_v13  ;;  %v117_v16 = vadd.f32 %v116_v15, %v114_v14  ;;  %p261_p10 = scmp.lt.s32.totalorder %s259_s8, %s255_s7 }
  0x1d   :  { %v118_v18 = vrot.slane %v117_v16, 4  ;;  %p262_p11 = por %p261_p10, %p260_p9 }
  0x1e   :  { %208 = vmatmul.mubr.msk.f32.vlgmr.msra.gmra.mrb[0].mxu0 %vm37_vm1, %v36_v17 }
  0x1f   :  { %v119_v19 = vadd.f32 %v118_v18, %v117_v16  ;;  %p263_p12 = pnand %p262_p11, %p256_p8 }
  0x21   :  { %v120_v20 = vrot.slane %v119_v19, 2 }
  0x23   :  { %v121_v21 = vadd.f32 %v120_v20, %v119_v19 }
  0x25   :  { %v122_v22 = vrot.slane %v121_v21, 1 }
  0x27   :  { %v123_v23 = vadd.f32 %v122_v22, %v121_v21 }
  0x29   :  { %v124_v24 = vmax.f32 %v123_v23, 1e-16 }
  0x2b   :  { %225 = vrsqrt.f32 %v124_v24 }
  0x35   :  { %v226_v25 = vpop.eup %225 }
  0x95   :  { %v149_v38 = vpop.permute.xlu0 %148 }
  0x96   :  { %vm154_vm2 = vcmp.eq.s32.totalorder %v149_v38, %v192_v37 }
  0x97   :  { %v193_v42 = vsel %vm154_vm2, 1.0, %v286_v1 }
  0x98   :  { %v157_v45 = vrot.slane %v193_v42, 4 }
  0x9a   :  { %v158_v48 = vadd.f32 %v193_v42, %v157_v45 }
  0x9c   :  { %v159_v49 = vrot.slane %v158_v48, 2 }
  0x9e   :  { %v160_v50 = vadd.f32 %v159_v49, %v158_v48 }
  0xa0   :  { %v161_v52 = vrot.slane %v160_v50, 1 }
  0xa2   :  { %v162_v55 = vadd.f32 %v161_v52, %v160_v50 }
  0xa4   :  { %v172_v58 = vmul.f32 8.0, %v162_v55 }
  0xf1   :  { %v107_v26 = vpop.f32.mrb[0].mxu0 }
  0xf2   :  { %v126_v27 = vmul.f32 %v226_v25, %v107_v26  ;;  %v209_v28 = vpop.f32.mrb[1].mxu0 }
  0xf4   :  { %v127_v29 = vrot.slane %v126_v27, 4 }
  0xf6   :  { %v128_v30 = vmax.f32 %v126_v27, %v127_v29 }
  0xf8   :  { %v129_v31 = vrot.slane %v128_v30, 2 }
  0xfa   :  { %v130_v32 = vmax.f32 %v128_v30, %v129_v31 }
  0xfc   :  { %v131_v33 = vrot.slane %v130_v32, 1 }
  0xfe   :  { %v132_v34 = vmax.f32 %v130_v32, %v131_v33 }
 0x100   :  { %v133_v35 = vsub.f32 %v126_v27, %v132_v34 }
 0x102   :  { %v134_v36 = vmul.f32 1.442695, %v133_v35 }
 0x104   :  { %227 = vpow2.f32 %v134_v36 }
 0x10e   :  { %v228_v39 = vpop.eup %227 }
 0x10f   :  { %v136_v40 = vrot.slane %v228_v39, 4 }
 0x111   :  { %v137_v41 = vadd.f32 %v228_v39, %v136_v40 }
 0x113   :  { %v138_v43 = vrot.slane %v137_v41, 2 }
 0x115   :  { %v139_v44 = vadd.f32 %v138_v43, %v137_v41 }
 0x117   :  { %v140_v46 = vrot.slane %v139_v44, 1 }
 0x119   :  { %v141_v47 = vadd.f32 %v140_v46, %v139_v44 }
 0x11b   :  { %229 = vlog2.f32 %v141_v47 }
 0x11c   :  { %231 = vrcp.f32 %v172_v58 }
 0x125   :  { %v230_v51 = vpop.eup %229 }
 0x126   :  { %v143_v53 = vmul.f32 0.6931472, %v230_v51  ;;  %v232_v2 = vpop.eup %231 }
 0x128   :  { %v144_v54 = vadd.f32 %v143_v53, %v132_v34 }
 0x12a   :  { %v163_v56 = vsub.f32 %v126_v27, %v144_v54 }
 0x12c   :  { %v164_v57 = vmul.f32 %v193_v42, %v163_v56 }
 0x12e   :  { %v165_v59 = vrot.slane %v164_v57, 4 }
 0x130   :  { %v166_v60 = vadd.f32 %v165_v59, %v164_v57 }
 0x132   :  { %v167_v61 = vrot.slane %v166_v60, 2 }
 0x134   :  { %v168_v62 = vadd.f32 %v167_v61, %v166_v60 }
 0x136   :  { %v169_v63 = vrot.slane %v168_v62, 1 }
 0x138   :  { %v170_v0 = vadd.f32 %v169_v63, %v168_v62 }
 0x13a   :  { %v171_v1 = vsub.f32 0.0, %v170_v0 }
 0x13c   :  { %v174_v3 = vmul.f32 %v232_v2, %v171_v1 }
 0x13e   :  { %175 = vst [vmem:[#allocation5] sm:$0x1] %v174_v3 }
 0x13f   :  { %266 = shalt.err (!%p263_p12)
}
 0x140   :  { %s267_s11 = scalar_lea.hbm %s351_s4, 16 }
 0x141   :  { %p268_p13 = scmp.ne.s32.totalorder %s351_s4, %s267_s11  ;;  %p271_p0 = scmp.lt.u32.totalorder %s267_s11, %s351_s4 }
 0x143   :  { %p273_p1 = pnand %p271_p0, %p268_p13 }
 0x145   :  { %276 = shalt.err (!%p273_p1)
}
 0x146   :  { %185 = dma.vmem_to_hbm [thread:$0]  %s183_s6, 16, %s351_s4, [#allocation4]  }
 0x147   :  { %279 = dma.done.wait [#allocation4], 16  }
 0x148   :  { %280 = vsyncadd [#allocation4], 4294967280 }
 0x149   :  { %189 = vsyncpa [#allocation3], 1 }
 0x14a   :  { %190 = vsyncpa [#allocation4], 1 }

</bundles_post_ra>
